<compile_context>
chip_gen: v6e
topology: v6e:2x2x1
jax: 0.10.0
libtpu: 0.0.40
codegen_flags: <defaults>
</compile_context>

<pallas_src>
from functools import partial

import jax
import jax.numpy as jnp
from jax.experimental import pallas as pl
from jax.experimental.pallas import tpu as pltpu

LANE = 128     # TPU vreg lane width
SUBLANE = 8    # TPU vreg sublane count (f32)


def _round_up(x, m):
    return ((x + m - 1) // m) * m


def _cdiv(a, b):
    return -(-a // b)


def _pad2(a, rows, cols):
    """Zero-pad a 2-D array up to (rows, cols)."""
    return jnp.pad(a, ((0, rows - a.shape[0]), (0, cols - a.shape[1])))


def _tpu_defaults():
    """Per-generation tile-batch / VMEM-limit / dtype defaults (review-driven)."""
    kind = ""
    try:
        kind = jax.devices()[0].device_kind.lower()
    except Exception:
        pass
    if "v5 lite" in kind or "v5e" in kind or "v5litepod" in kind:
        # v5e: 16 MiB default scoped VMEM, compute-bound -> smaller tiles are free.
        return dict(tile_batch=256, vmem_limit=64 << 20, sigmoid_bf16=False, two_core=False)
    if "v6" in kind:
        # v6e: HBM-bound; bigger tiles amortize step overhead; bf16 EUP available.
        return dict(tile_batch=1024, vmem_limit=64 << 20, sigmoid_bf16=True, two_core=False)
    if "v7" in kind:
        # v7x: 64 MiB VMEM/TC; cap TB at 1024 and keep >=2 grid steps for both TCs.
        return dict(tile_batch=1024, vmem_limit=48 << 20, sigmoid_bf16=True, two_core=True)
    # Unknown chip / interpreter: conservative defaults.
    return dict(tile_batch=512, vmem_limit=64 << 20, sigmoid_bf16=False, two_core=False)


def vae_kernel(
    x_ref, eps_ref,
    w1_ref, b1_ref, w2_ref, b2_ref,
    wh_ref, bh_ref,                       # fused [mu | logvar] head
    dw1_ref, db1_ref, dw2_ref, db2_ref, dw3_ref, db3_ref,
    recon_ref, lat_ref,
    *, latent_pad, sigmoid_bf16,
):
    f32 = jnp.float32
    bf16 = jnp.bfloat16

    # x arrives in its natural (f32, unpadded-feature) layout; cast in-kernel.
    x = x_ref[...].astype(bf16)

    # ---- encoder: Linear -> ReLU -> (Dropout=id) -> Linear -> ReLU -> (Dropout=id)
    h1 = jnp.dot(x, w1_ref[...], preferred_element_type=f32) + b1_ref[...]
    h1 = jnp.maximum(h1, 0.0)
    h2 = jnp.dot(h1.astype(bf16), w2_ref[...], preferred_element_type=f32) + b2_ref[...]
    h2 = jnp.maximum(h2, 0.0)

    # ---- fused latent heads: one matmul producing [mu | logvar]; one wide f32 store
    heads = jnp.dot(h2.astype(bf16), wh_ref[...], preferred_element_type=f32) + bh_ref[...]
    lat_ref[...] = heads

    mu = heads[:, :latent_pad]
    logvar = heads[:, latent_pad:]

    # ---- reparameterize (f32): z = mu + eps * exp(0.5 * logvar)
    eps = eps_ref[...].astype(f32)
    z = mu + eps * jnp.exp(0.5 * logvar)

    # ---- decoder: Linear -> ReLU -> (Dropout=id) -> Linear -> ReLU -> (Dropout=id) -> Linear -> Sigmoid
    d1 = jnp.dot(z.astype(bf16), dw1_ref[...], preferred_element_type=f32) + db1_ref[...]
    d1 = jnp.maximum(d1, 0.0)
    d2 = jnp.dot(d1.astype(bf16), dw2_ref[...], preferred_element_type=f32) + db2_ref[...]
    d2 = jnp.maximum(d2, 0.0)
    logits = jnp.dot(d2.astype(bf16), dw3_ref[...], preferred_element_type=f32) + db3_ref[...]

    if sigmoid_bf16:
        recon = jax.nn.sigmoid(logits.astype(bf16))   # bf16 EUP (v6e/v7x)
    else:
        recon = jax.nn.sigmoid(logits)                 # f32 EUP (v5e / unknown)
    recon_ref[...] = recon.astype(recon_ref.dtype)


def prepare_params(params):
    """One-time padding / head fusion / bf16 cast of the VAE weights.

    Call once outside the hot path; the result is reused by every vae_forward
    call so the per-call wrapper does no weight repacking (no extra HBM passes).
    """
    f32, bf16 = jnp.float32, jnp.bfloat16
    D, H = params["w1"].shape
    H2 = params["w2"].shape[1]
    L = params["wmu"].shape[1]
    Hp, H2p, Lp, Dp = (_round_up(v, LANE) for v in (H, H2, L, D))

    def padw(w, rows, cols):
        return _pad2(w.astype(f32), rows, cols).astype(bf16)

    def padb(b, cols):
        return _pad2(b.astype(f32).reshape(1, -1), 1, cols)

    # fused [mu | logvar] head: columns [0:Lp) = mu head, [Lp:2Lp) = logvar head
    wh = jnp.zeros((H2p, 2 * Lp), f32)
    wh = wh.at[:H2, :L].set(params["wmu"]).at[:H2, Lp:Lp + L].set(params["wvar"])
    bh = jnp.zeros((1, 2 * Lp), f32)
    bh = bh.at[:, :L].set(params["bmu"].reshape(1, -1))
    bh = bh.at[:, Lp:Lp + L].set(params["bvar"].reshape(1, -1))

    return dict(
        # NOTE: w1's contraction dim stays unpadded (D) since x is consumed unpadded.
        w1=padw(params["w1"], D, Hp),      b1=padb(params["b1"], Hp),
        w2=padw(params["w2"], Hp, H2p),    b2=padb(params["b2"], H2p),
        wh=wh.astype(bf16),                bh=bh,
        dw1=padw(params["dw1"], Lp, H2p),  db1=padb(params["db1"], H2p),
        dw2=padw(params["dw2"], H2p, Hp),  db2=padb(params["db2"], Hp),
        dw3=padw(params["dw3"], Hp, Dp),   db3=padb(params["db3"], Dp),
    )


def vae_forward(x, eps, prepared, *, tile_batch=None, vmem_limit_bytes=None,
                sigmoid_bf16=None, unpad=True):
    """Batch-tiled Pallas call with VMEM-resident, pre-padded bf16 weights.

    x:   (B, D) float array   eps: (B, L) float array (standard-normal draws)
    prepared: output of prepare_params(params).
    With unpad=False the padded slabs are returned directly (no strip copies),
    for fusing a follow-on loss kernel.
    """
    defaults = _tpu_defaults()
    tile_batch = defaults["tile_batch"] if tile_batch is None else tile_batch
    vmem_limit_bytes = defaults["vmem_limit"] if vmem_limit_bytes is None else vmem_limit_bytes
    sigmoid_bf16 = defaults["sigmoid_bf16"] if sigmoid_bf16 is None else sigmoid_bf16

    B, D = x.shape
    L = eps.shape[1]
    assert prepared["w1"].shape[0] == D, "prepared params do not match input_dim"

    Hp = prepared["w1"].shape[1]
    H2p = prepared["w2"].shape[1]
    Lp = prepared["wh"].shape[1] // 2
    Dp = prepared["dw3"].shape[1]

    # batch tile: clamp to the (sublane-aligned) batch; on v7x ensure >=2 grid
    # steps so dimension_semantics=("parallel",) feeds both TensorCores.
    TB = min(tile_batch, _round_up(B, SUBLANE))
    if defaults["two_core"] and B > SUBLANE and B <= TB:
        TB = max(SUBLANE, _round_up(_cdiv(B, 2), SUBLANE))
    Bp = _round_up(B, TB)
    grid = (Bp // TB,)

    # Only pad what is strictly needed (batch remainder; tiny latent width).
    xp = x if Bp == B else jnp.pad(x, ((0, Bp - B), (0, 0)))
    epsp = eps if (Bp == B and Lp == L) else jnp.pad(eps, ((0, Bp - B), (0, Lp - L)))

    def batch_spec(cols):
        return pl.BlockSpec((TB, cols), lambda i: (i, 0))

    def resident(arr):
        # full-array block, same index every grid step -> stays VMEM-resident
        return pl.BlockSpec(arr.shape, lambda i: (0, 0))

    p = prepared
    in_specs = [
        batch_spec(D),           # x (full unpadded feature width as block width)
        batch_spec(Lp),          # eps
        resident(p["w1"]), resident(p["b1"]),
        resident(p["w2"]), resident(p["b2"]),
        resident(p["wh"]), resident(p["bh"]),
        resident(p["dw1"]), resident(p["db1"]),
        resident(p["dw2"]), resident(p["db2"]),
        resident(p["dw3"]), resident(p["db3"]),
    ]

    recon_p, lat_p = pl.pallas_call(
        partial(vae_kernel, latent_pad=Lp, sigmoid_bf16=sigmoid_bf16),
        out_shape=(
            jax.ShapeDtypeStruct((Bp, Dp), jnp.bfloat16),     # recon (bf16 -> half the HBM)
            jax.ShapeDtypeStruct((Bp, 2 * Lp), jnp.float32),  # [mu | logvar] kept f32
        ),
        grid=grid,
        in_specs=in_specs,
        out_specs=(
            pl.BlockSpec((TB, Dp), lambda i: (i, 0)),
            pl.BlockSpec((TB, 2 * Lp), lambda i: (i, 0)),
        ),
        compiler_params=pltpu.CompilerParams(
            dimension_semantics=("parallel",),   # batch tiles are independent (megacore)
            vmem_limit_bytes=vmem_limit_bytes,
        ),
    )(xp, epsp,
      p["w1"], p["b1"], p["w2"], p["b2"], p["wh"], p["bh"],
      p["dw1"], p["db1"], p["dw2"], p["db2"], p["dw3"], p["db3"])

    if not unpad:
        return recon_p, lat_p   # padded slabs for downstream fusion

    recon = recon_p[:B, :D]
    mu = lat_p[:B, :L]
    logvar = lat_p[:B, Lp:Lp + L]
    return recon, mu, logvar


def init_params(key, input_dim, hidden_dim, latent_dim):
    """Deterministic parameter init (PyTorch-style uniform(-1/sqrt(fan_in), +1/sqrt(fan_in)))."""
    h2 = hidden_dim // 2

    def linear(key, fan_in, fan_out):
        kw, kb = jax.random.split(key)
        bound = 1.0 / jnp.sqrt(jnp.float32(fan_in))
        w = jax.random.uniform(kw, (fan_in, fan_out), jnp.float32, -bound, bound)
        b = jax.random.uniform(kb, (1, fan_out), jnp.float32, -bound, bound)
        return w, b

    keys = jax.random.split(key, 7)
    w1, b1 = linear(keys[0], input_dim, hidden_dim)
    w2, b2 = linear(keys[1], hidden_dim, h2)
    wmu, bmu = linear(keys[2], h2, latent_dim)
    wvar, bvar = linear(keys[3], h2, latent_dim)
    dw1, db1 = linear(keys[4], latent_dim, h2)
    dw2, db2 = linear(keys[5], h2, hidden_dim)
    dw3, db3 = linear(keys[6], hidden_dim, input_dim)

    return dict(
        w1=w1, b1=b1, w2=w2, b2=b2,
        wmu=wmu, bmu=bmu, wvar=wvar, bvar=bvar,
        dw1=dw1, db1=db1, dw2=dw2, db2=db2, dw3=dw3, db3=db3,
    )


if __name__ == "__main__":
    # Small, deterministic example shapes (tune at production shapes, e.g.
    # 784/512/64 with batch in the thousands — this is a smoke test).
    input_dim, hidden_dim, latent_dim = 16, 32, 8
    batch = 8

    key = jax.random.PRNGKey(0)
    k_params, k_x, k_eps = jax.random.split(key, 3)

    params = init_params(k_params, input_dim, hidden_dim, latent_dim)
    prepared = prepare_params(params)          # one-time weight pad/fuse/cast

    x = jax.random.uniform(k_x, (batch, input_dim), jnp.float32)
    # eps for the reparameterization trick (torch.randn_like equivalent, fixed seed)
    eps = jax.random.normal(k_eps, (batch, latent_dim), jnp.float32)

    recon, mu, logvar = vae_forward(x, eps, prepared)
    jax.block_until_ready((recon, mu, logvar))

    assert recon.shape == (batch, input_dim)
    assert mu.shape == (batch, latent_dim)
    assert logvar.shape == (batch, latent_dim)
    assert bool(jnp.all(jnp.isfinite(recon.astype(jnp.float32))))
    assert bool(jnp.all(jnp.isfinite(mu)))
    assert bool(jnp.all(jnp.isfinite(logvar)))
    assert bool(jnp.all((recon >= 0.0) & (recon <= 1.0)))  # sigmoid output range

    print("KERNEL_OK")
</pallas_src>

<mosaic_0001>
module attributes {stable_mosaic.version = 11 : i64} {
  func.func @vae_kernel(%arg0: i32, %arg1: memref<8x16xf32, #tpu.memory_space<vmem>>, %arg2: memref<8x128xf32, #tpu.memory_space<vmem>>, %arg3: memref<16x128xbf16, #tpu.memory_space<vmem>>, %arg4: memref<1x128xf32, #tpu.memory_space<vmem>>, %arg5: memref<128x128xbf16, #tpu.memory_space<vmem>>, %arg6: memref<1x128xf32, #tpu.memory_space<vmem>>, %arg7: memref<128x256xbf16, #tpu.memory_space<vmem>>, %arg8: memref<1x256xf32, #tpu.memory_space<vmem>>, %arg9: memref<128x128xbf16, #tpu.memory_space<vmem>>, %arg10: memref<1x128xf32, #tpu.memory_space<vmem>>, %arg11: memref<128x128xbf16, #tpu.memory_space<vmem>>, %arg12: memref<1x128xf32, #tpu.memory_space<vmem>>, %arg13: memref<128x128xbf16, #tpu.memory_space<vmem>>, %arg14: memref<1x128xf32, #tpu.memory_space<vmem>>, %arg15: memref<8x128xbf16, #tpu.memory_space<vmem>>, %arg16: memref<8x256xf32, #tpu.memory_space<vmem>>) attributes {dimension_semantics = [#tpu.dimension_semantics<parallel>], iteration_bounds = array<i64: 1>, scalar_prefetch = 0 : i64, scratch_operands = 0 : i64, tpu.core_type = #tpu.core_type<tc>, window_params = [{transform_indices = @transform_0, window_bounds = array<i64: 8, 16>}, {transform_indices = @transform_1, window_bounds = array<i64: 8, 128>}, {pipeline_mode = #tpu.pipeline_mode<synchronous>, transform_indices = @transform_2, window_bounds = array<i64: 16, 128>}, {pipeline_mode = #tpu.pipeline_mode<synchronous>, transform_indices = @transform_3, window_bounds = array<i64: 1, 128>}, {pipeline_mode = #tpu.pipeline_mode<synchronous>, transform_indices = @transform_4, window_bounds = array<i64: 128, 128>}, {pipeline_mode = #tpu.pipeline_mode<synchronous>, transform_indices = @transform_5, window_bounds = array<i64: 1, 128>}, {pipeline_mode = #tpu.pipeline_mode<synchronous>, transform_indices = @transform_6, window_bounds = array<i64: 128, 256>}, {pipeline_mode = #tpu.pipeline_mode<synchronous>, transform_indices = @transform_7, window_bounds = array<i64: 1, 256>}, {pipeline_mode = #tpu.pipeline_mode<synchronous>, transform_indices = @transform_8, window_bounds = array<i64: 128, 128>}, {pipeline_mode = #tpu.pipeline_mode<synchronous>, transform_indices = @transform_9, window_bounds = array<i64: 1, 128>}, {pipeline_mode = #tpu.pipeline_mode<synchronous>, transform_indices = @transform_10, window_bounds = array<i64: 128, 128>}, {pipeline_mode = #tpu.pipeline_mode<synchronous>, transform_indices = @transform_11, window_bounds = array<i64: 1, 128>}, {pipeline_mode = #tpu.pipeline_mode<synchronous>, transform_indices = @transform_12, window_bounds = array<i64: 128, 128>}, {pipeline_mode = #tpu.pipeline_mode<synchronous>, transform_indices = @transform_13, window_bounds = array<i64: 1, 128>}, {transform_indices = @transform_14, window_bounds = array<i64: 8, 128>}, {transform_indices = @transform_15, window_bounds = array<i64: 8, 256>}]} {
    %c0 = arith.constant 0 : index
    %c0_0 = arith.constant 0 : index
    %0 = vector.load %arg1[%c0, %c0_0] : memref<8x16xf32, #tpu.memory_space<vmem>>, vector<8x16xf32>
    %1 = arith.truncf %0 : vector<8x16xf32> to vector<8x16xbf16>
    %c0_1 = arith.constant 0 : index
    %c0_2 = arith.constant 0 : index
    %2 = vector.load %arg3[%c0_1, %c0_2] : memref<16x128xbf16, #tpu.memory_space<vmem>>, vector<16x128xbf16>
    %cst = arith.constant dense<0.000000e+00> : vector<8x128xf32>
    %3 = tpu.matmul %1, %2, %cst {dimension_numbers = #tpu.dot_dimension_numbers<[1], [0], [0], [1], [0, 0, 1, 1], [], []>} : vector<8x16xbf16>, vector<16x128xbf16>, vector<8x128xf32> -> vector<8x128xf32>
    %c0_3 = arith.constant 0 : index
    %c0_4 = arith.constant 0 : index
    %4 = vector.load %arg4[%c0_3, %c0_4] : memref<1x128xf32, #tpu.memory_space<vmem>>, vector<1x128xf32>
    %5 = vector.broadcast %4 : vector<1x128xf32> to vector<8x128xf32>
    %6 = arith.addf %3, %5 : vector<8x128xf32>
    %cst_5 = arith.constant 0.000000e+00 : f32
    %7 = vector.broadcast %cst_5 : f32 to vector<8x128xf32>
    %8 = arith.maximumf %6, %7 : vector<8x128xf32>
    %9 = arith.truncf %8 : vector<8x128xf32> to vector<8x128xbf16>
    %c0_6 = arith.constant 0 : index
    %c0_7 = arith.constant 0 : index
    %10 = vector.load %arg5[%c0_6, %c0_7] : memref<128x128xbf16, #tpu.memory_space<vmem>>, vector<128x128xbf16>
    %cst_8 = arith.constant dense<0.000000e+00> : vector<8x128xf32>
    %11 = tpu.matmul %9, %10, %cst_8 {dimension_numbers = #tpu.dot_dimension_numbers<[1], [0], [0], [1], [0, 0, 1, 1], [], []>} : vector<8x128xbf16>, vector<128x128xbf16>, vector<8x128xf32> -> vector<8x128xf32>
    %c0_9 = arith.constant 0 : index
    %c0_10 = arith.constant 0 : index
    %12 = vector.load %arg6[%c0_9, %c0_10] : memref<1x128xf32, #tpu.memory_space<vmem>>, vector<1x128xf32>
    %13 = vector.broadcast %12 : vector<1x128xf32> to vector<8x128xf32>
    %14 = arith.addf %11, %13 : vector<8x128xf32>
    %cst_11 = arith.constant 0.000000e+00 : f32
    %15 = vector.broadcast %cst_11 : f32 to vector<8x128xf32>
    %16 = arith.maximumf %14, %15 : vector<8x128xf32>
    %17 = arith.truncf %16 : vector<8x128xf32> to vector<8x128xbf16>
    %c0_12 = arith.constant 0 : index
    %c0_13 = arith.constant 0 : index
    %18 = vector.load %arg7[%c0_12, %c0_13] : memref<128x256xbf16, #tpu.memory_space<vmem>>, vector<128x256xbf16>
    %cst_14 = arith.constant dense<0.000000e+00> : vector<8x256xf32>
    %19 = tpu.matmul %17, %18, %cst_14 {dimension_numbers = #tpu.dot_dimension_numbers<[1], [0], [0], [1], [0, 0, 1, 1], [], []>} : vector<8x128xbf16>, vector<128x256xbf16>, vector<8x256xf32> -> vector<8x256xf32>
    %c0_15 = arith.constant 0 : index
    %c0_16 = arith.constant 0 : index
    %20 = vector.load %arg8[%c0_15, %c0_16] : memref<1x256xf32, #tpu.memory_space<vmem>>, vector<1x256xf32>
    %21 = vector.broadcast %20 : vector<1x256xf32> to vector<8x256xf32>
    %22 = arith.addf %19, %21 : vector<8x256xf32>
    %c0_17 = arith.constant 0 : index
    %c0_18 = arith.constant 0 : index
    %23 = vector.load %arg16[%c0_17, %c0_18] : memref<8x256xf32, #tpu.memory_space<vmem>>, vector<8x256xf32>
    tpu.vector_store %arg16[%c0_17, %c0_18], %22 {strides = array<i32>} : memref<8x256xf32, #tpu.memory_space<vmem>>, vector<8x256xf32>,
    %24 = vector.extract_strided_slice %22 {offsets = [0, 0], sizes = [8, 128], strides = [1, 1]} : vector<8x256xf32> to vector<8x128xf32>
    %25 = vector.extract_strided_slice %22 {offsets = [0, 128], sizes = [8, 128], strides = [1, 1]} : vector<8x256xf32> to vector<8x128xf32>
    %c0_19 = arith.constant 0 : index
    %c0_20 = arith.constant 0 : index
    %26 = vector.load %arg2[%c0_19, %c0_20] : memref<8x128xf32, #tpu.memory_space<vmem>>, vector<8x128xf32>
    %cst_21 = arith.constant 5.000000e-01 : f32
    %27 = vector.broadcast %cst_21 : f32 to vector<8x128xf32>
    %28 = arith.mulf %27, %25 : vector<8x128xf32>
    %29 = math.exp %28 : vector<8x128xf32>
    %30 = arith.mulf %26, %29 : vector<8x128xf32>
    %31 = arith.addf %24, %30 : vector<8x128xf32>
    %32 = arith.truncf %31 : vector<8x128xf32> to vector<8x128xbf16>
    %c0_22 = arith.constant 0 : index
    %c0_23 = arith.constant 0 : index
    %33 = vector.load %arg9[%c0_22, %c0_23] : memref<128x128xbf16, #tpu.memory_space<vmem>>, vector<128x128xbf16>
    %cst_24 = arith.constant dense<0.000000e+00> : vector<8x128xf32>
    %34 = tpu.matmul %32, %33, %cst_24 {dimension_numbers = #tpu.dot_dimension_numbers<[1], [0], [0], [1], [0, 0, 1, 1], [], []>} : vector<8x128xbf16>, vector<128x128xbf16>, vector<8x128xf32> -> vector<8x128xf32>
    %c0_25 = arith.constant 0 : index
    %c0_26 = arith.constant 0 : index
    %35 = vector.load %arg10[%c0_25, %c0_26] : memref<1x128xf32, #tpu.memory_space<vmem>>, vector<1x128xf32>
    %36 = vector.broadcast %35 : vector<1x128xf32> to vector<8x128xf32>
    %37 = arith.addf %34, %36 : vector<8x128xf32>
    %cst_27 = arith.constant 0.000000e+00 : f32
    %38 = vector.broadcast %cst_27 : f32 to vector<8x128xf32>
    %39 = arith.maximumf %37, %38 : vector<8x128xf32>
    %40 = arith.truncf %39 : vector<8x128xf32> to vector<8x128xbf16>
    %c0_28 = arith.constant 0 : index
    %c0_29 = arith.constant 0 : index
    %41 = vector.load %arg11[%c0_28, %c0_29] : memref<128x128xbf16, #tpu.memory_space<vmem>>, vector<128x128xbf16>
    %cst_30 = arith.constant dense<0.000000e+00> : vector<8x128xf32>
    %42 = tpu.matmul %40, %41, %cst_30 {dimension_numbers = #tpu.dot_dimension_numbers<[1], [0], [0], [1], [0, 0, 1, 1], [], []>} : vector<8x128xbf16>, vector<128x128xbf16>, vector<8x128xf32> -> vector<8x128xf32>
    %c0_31 = arith.constant 0 : index
    %c0_32 = arith.constant 0 : index
    %43 = vector.load %arg12[%c0_31, %c0_32] : memref<1x128xf32, #tpu.memory_space<vmem>>, vector<1x128xf32>
    %44 = vector.broadcast %43 : vector<1x128xf32> to vector<8x128xf32>
    %45 = arith.addf %42, %44 : vector<8x128xf32>
    %cst_33 = arith.constant 0.000000e+00 : f32
    %46 = vector.broadcast %cst_33 : f32 to vector<8x128xf32>
    %47 = arith.maximumf %45, %46 : vector<8x128xf32>
    %48 = arith.truncf %47 : vector<8x128xf32> to vector<8x128xbf16>
    %c0_34 = arith.constant 0 : index
    %c0_35 = arith.constant 0 : index
    %49 = vector.load %arg13[%c0_34, %c0_35] : memref<128x128xbf16, #tpu.memory_space<vmem>>, vector<128x128xbf16>
    %cst_36 = arith.constant dense<0.000000e+00> : vector<8x128xf32>
    %50 = tpu.matmul %48, %49, %cst_36 {dimension_numbers = #tpu.dot_dimension_numbers<[1], [0], [0], [1], [0, 0, 1, 1], [], []>} : vector<8x128xbf16>, vector<128x128xbf16>, vector<8x128xf32> -> vector<8x128xf32>
    %c0_37 = arith.constant 0 : index
    %c0_38 = arith.constant 0 : index
    %51 = vector.load %arg14[%c0_37, %c0_38] : memref<1x128xf32, #tpu.memory_space<vmem>>, vector<1x128xf32>
    %52 = vector.broadcast %51 : vector<1x128xf32> to vector<8x128xf32>
    %53 = arith.addf %50, %52 : vector<8x128xf32>
    %54 = arith.negf %53 : vector<8x128xf32>
    %55 = math.exp %54 : vector<8x128xf32>
    %cst_39 = arith.constant 1.000000e+00 : f32
    %56 = vector.broadcast %cst_39 : f32 to vector<8x128xf32>
    %57 = arith.addf %56, %55 : vector<8x128xf32>
    %58 = arith.divf %56, %57 : vector<8x128xf32>
    %59 = arith.truncf %58 : vector<8x128xf32> to vector<8x128xbf16>
    %c0_40 = arith.constant 0 : index
    %c0_41 = arith.constant 0 : index
    %60 = vector.load %arg15[%c0_40, %c0_41] : memref<8x128xbf16, #tpu.memory_space<vmem>>, vector<8x128xbf16>
    tpu.vector_store %arg15[%c0_40, %c0_41], %59 {strides = array<i32>} : memref<8x128xbf16, #tpu.memory_space<vmem>>, vector<8x128xbf16>,
    return
  }
  func.func @transform_0(%arg0: i32) -> (i32, i32) {
    %c0_i32 = arith.constant 0 : i32
    %c0_i32_0 = arith.constant 0 : i32
    return %arg0, %c0_i32 : i32, i32
  }
  func.func @transform_1(%arg0: i32) -> (i32, i32) {
    %c0_i32 = arith.constant 0 : i32
    %c0_i32_0 = arith.constant 0 : i32
    return %arg0, %c0_i32 : i32, i32
  }
  func.func @transform_2(%arg0: i32) -> (i32, i32) {
    %c0_i32 = arith.constant 0 : i32
    %c0_i32_0 = arith.constant 0 : i32
    %c0_i32_1 = arith.constant 0 : i32
    return %c0_i32, %c0_i32_0 : i32, i32
  }
  func.func @transform_3(%arg0: i32) -> (i32, i32) {
    %c0_i32 = arith.constant 0 : i32
    %c0_i32_0 = arith.constant 0 : i32
    %c0_i32_1 = arith.constant 0 : i32
    return %c0_i32, %c0_i32_0 : i32, i32
  }
  func.func @transform_4(%arg0: i32) -> (i32, i32) {
    %c0_i32 = arith.constant 0 : i32
    %c0_i32_0 = arith.constant 0 : i32
    %c0_i32_1 = arith.constant 0 : i32
    return %c0_i32, %c0_i32_0 : i32, i32
  }
  func.func @transform_5(%arg0: i32) -> (i32, i32) {
    %c0_i32 = arith.constant 0 : i32
    %c0_i32_0 = arith.constant 0 : i32
    %c0_i32_1 = arith.constant 0 : i32
    return %c0_i32, %c0_i32_0 : i32, i32
  }
  func.func @transform_6(%arg0: i32) -> (i32, i32) {
    %c0_i32 = arith.constant 0 : i32
    %c0_i32_0 = arith.constant 0 : i32
    %c0_i32_1 = arith.constant 0 : i32
    return %c0_i32, %c0_i32_0 : i32, i32
  }
  func.func @transform_7(%arg0: i32) -> (i32, i32) {
    %c0_i32 = arith.constant 0 : i32
    %c0_i32_0 = arith.constant 0 : i32
    %c0_i32_1 = arith.constant 0 : i32
    return %c0_i32, %c0_i32_0 : i32, i32
  }
  func.func @transform_8(%arg0: i32) -> (i32, i32) {
    %c0_i32 = arith.constant 0 : i32
    %c0_i32_0 = arith.constant 0 : i32
    %c0_i32_1 = arith.constant 0 : i32
    return %c0_i32, %c0_i32_0 : i32, i32
  }
  func.func @transform_9(%arg0: i32) -> (i32, i32) {
    %c0_i32 = arith.constant 0 : i32
    %c0_i32_0 = arith.constant 0 : i32
    %c0_i32_1 = arith.constant 0 : i32
    return %c0_i32, %c0_i32_0 : i32, i32
  }
  func.func @transform_10(%arg0: i32) -> (i32, i32) {
    %c0_i32 = arith.constant 0 : i32
    %c0_i32_0 = arith.constant 0 : i32
    %c0_i32_1 = arith.constant 0 : i32
    return %c0_i32, %c0_i32_0 : i32, i32
  }
  func.func @transform_11(%arg0: i32) -> (i32, i32) {
    %c0_i32 = arith.constant 0 : i32
    %c0_i32_0 = arith.constant 0 : i32
    %c0_i32_1 = arith.constant 0 : i32
    return %c0_i32, %c0_i32_0 : i32, i32
  }
  func.func @transform_12(%arg0: i32) -> (i32, i32) {
    %c0_i32 = arith.constant 0 : i32
    %c0_i32_0 = arith.constant 0 : i32
    %c0_i32_1 = arith.constant 0 : i32
    return %c0_i32, %c0_i32_0 : i32, i32
  }
  func.func @transform_13(%arg0: i32) -> (i32, i32) {
    %c0_i32 = arith.constant 0 : i32
    %c0_i32_0 = arith.constant 0 : i32
    %c0_i32_1 = arith.constant 0 : i32
    return %c0_i32, %c0_i32_0 : i32, i32
  }
  func.func @transform_14(%arg0: i32) -> (i32, i32) {
    %c0_i32 = arith.constant 0 : i32
    %c0_i32_0 = arith.constant 0 : i32
    return %arg0, %c0_i32 : i32, i32
  }
  func.func @transform_15(%arg0: i32) -> (i32, i32) {
    %c0_i32 = arith.constant 0 : i32
    %c0_i32_0 = arith.constant 0 : i32
    return %arg0, %c0_i32 : i32, i32
  }
}

</mosaic_0001>

<bundles_post_ra>
// kernel: tpu_custom_call.1
= control target key start
LH: loop header
LB: loop body
LE: loop exit
PB: predicated region body
PF: predicated region fallthrough
CT: control target
= control target key end

     0   :  { %21 = vsyncpa [#allocation3], 0  ;;  %s1546_s0 = inlined_call_operand.hbm [shape: f32[8,16], index: 0, kind: input, shape index: {}]   ;;  %s1547_s1 = inlined_call_operand.hbm [shape: f32[8,128], index: 1, kind: input, shape index: {}]   ;;  %s1548_s2 = inlined_call_operand.hbm [shape: bf16[16,128], index: 2, kind: input, shape index: {}]   ;;  %s1549_s3 = inlined_call_operand.vmem [shape: f32[1,128], index: 3, kind: input, shape index: {}]   ;;  %s1550_s4 = inlined_call_operand.hbm [shape: bf16[128,128], index: 4, kind: input, shape index: {}]   ;;  %s1551_s5 = inlined_call_operand.vmem [shape: f32[1,128], index: 5, kind: input, shape index: {}]   ;;  %s1552_s6 = inlined_call_operand.hbm [shape: bf16[128,256], index: 6, kind: input, shape index: {}]   ;;  %s1553_s7 = inlined_call_operand.vmem [shape: f32[1,256], index: 7, kind: input, shape index: {}]   ;;  %s1554_s8 = inlined_call_operand.hbm [shape: bf16[128,128], index: 8, kind: input, shape index: {}]   ;;  %s1555_s9 = inlined_call_operand.vmem [shape: f32[1,128], index: 9, kind: input, shape index: {}]   ;;  %s1556_s10 = inlined_call_operand.hbm [shape: bf16[128,128], index: 10, kind: input, shape index: {}]   ;;  %s1557_s11 = inlined_call_operand.vmem [shape: f32[1,128], index: 11, kind: input, shape index: {}]   ;;  %s1558_s12 = inlined_call_operand.hbm [shape: bf16[128,128], index: 12, kind: input, shape index: {}]   ;;  %s1559_s13 = inlined_call_operand.vmem [shape: f32[1,128], index: 13, kind: input, shape index: {}]   ;;  %s1560_s14 = inlined_call_operand.hbm [shape: bf16[8,128], index: 14, kind: output, shape index: {0}]   ;;  %s1561_s15 = inlined_call_operand.hbm [shape: f32[8,256], index: 15, kind: output, shape index: {1}]  }
   0x1   :  { %22 = vsyncpa [#allocation6], 0 }
   0x2   :  { %23 = vsyncpa [#allocation9], 0 }
   0x3   :  { %24 = vsyncpa [#allocation12], 0 }
   0x4   :  { %25 = vsyncpa [#allocation15], 0 }
   0x5   :  { %26 = vsyncpa [#allocation4], 0 }
   0x6   :  { %27 = vsyncpa [#allocation18], 0  ;;  %s1343_s18 = smov [#allocation5]  }
   0x7   :  { %s44_s19 = sshll.u32 %s1343_s18, 4  ;;  %s45_s19 = int_to_ptr.vmem [resolvable:$true] %s44_s19 }
   0x8   :  { %s1137_s20 = scalar_lea.vmem %s45_s19, 128  ;;  %p1142_p1 = scmp.lt.s32.totalorder %s45_s19, %s45_s19 }
   0x9   :  { %p1138_p0 = scmp.ne.s32.totalorder %s45_s19, %s1137_s20  ;;  %p1143_p2 = scmp.lt.s32.totalorder %s1137_s20, %s1137_s20 }
   0xb   :  { %p1144_p3 = por %p1143_p2, %p1142_p1 }
   0xd   :  { %p1145_p4 = pnand %p1144_p3, %p1138_p0 }
   0xf   :  { %1148 = shalt.err (!%p1145_p4)
}
  0x10   :  { %47 = dma.hbm_to_vmem [thread:$0]  %s1547_s1, 128, %s45_s19, [#allocation6]  }
  0x11   :  { %s1344_s23 = smov [#allocation8]   ;;  %s1345_s25 = smov [#allocation11]  }
  0x12   :  { %s67_s24 = sshll.u32 %s1344_s23, 4  ;;  %s95_s26 = sshll.u32 %s1345_s25, 4  ;;  %s68_s24 = int_to_ptr.vmem [resolvable:$true] %s67_s24  ;;  %s96_s26 = int_to_ptr.vmem [resolvable:$true] %s95_s26 }
  0x13   :  { %s1157_s27 = scalar_lea.vmem %s68_s24, 1024  ;;  %p1162_p6 = scmp.lt.s32.totalorder %s68_s24, %s68_s24 }
  0x14   :  { %p1158_p5 = scmp.ne.s32.totalorder %s68_s24, %s1157_s27  ;;  %p1163_p7 = scmp.lt.s32.totalorder %s1157_s27, %s1157_s27 }
  0x16   :  { %p1164_p8 = por %p1163_p7, %p1162_p6 }
  0x18   :  { %p1165_p9 = pnand %p1164_p8, %p1158_p5 }
  0x1a   :  { %1168 = shalt.err (!%p1165_p9)
}
  0x1b   :  { %s1346_s28 = smov 64   ;;  %s1347_s29 = smov 4  }
  0x1c   :  { %73 = dma.hbm_to_vmem [thread:$0]  %s1550_s4, 1024, %s68_s24, [#allocation9], %s1346_s28, %s1346_s28, %s1347_s29  }
  0x1d   :  { %s1177_s1 = scalar_lea.vmem %s96_s26, 1024  ;;  %p1182_p11 = scmp.lt.s32.totalorder %s96_s26, %s96_s26 }
  0x1e   :  { %p1178_p10 = scmp.ne.s32.totalorder %s96_s26, %s1177_s1  ;;  %p1183_p12 = scmp.lt.s32.totalorder %s1177_s1, %s1177_s1 }
  0x20   :  { %p1184_p13 = por %p1183_p12, %p1182_p11 }
  0x22   :  { %p1185_p0 = pnand %p1184_p13, %p1178_p10 }
  0x24   :  { %1188 = shalt.err (!%p1185_p0)
}
  0x25   :  { %101 = dma.hbm_to_vmem [thread:$0]  %s1554_s8, 1024, %s96_s26, [#allocation12], %s1346_s28, %s1346_s28, %s1347_s29  }
  0x26   :  { %s1348_s19 = smov [#allocation2]   ;;  %s1349_s21 = smov [#allocation7]  }
  0x27   :  { %s34_s20 = sshll.u32 %s1348_s19, 4  ;;  %s53_s4 = sshll.u32 %s1349_s21, 4  ;;  %s35_s20 = int_to_ptr.vmem [resolvable:$true] %s34_s20  ;;  %s54_s4 = int_to_ptr.vmem [resolvable:$true] %s53_s4 }
  0x28   :  { %s1197_s22 = scalar_lea.vmem %s35_s20, 128  ;;  %p1202_p2 = scmp.lt.s32.totalorder %s35_s20, %s35_s20 }
  0x29   :  { %p1198_p1 = scmp.ne.s32.totalorder %s35_s20, %s1197_s22  ;;  %p1203_p3 = scmp.lt.s32.totalorder %s1197_s22, %s1197_s22 }
  0x2b   :  { %p1204_p4 = por %p1203_p3, %p1202_p2 }
  0x2d   :  { %p1205_p5 = pnand %p1204_p4, %p1198_p1 }
  0x2f   :  { %1208 = shalt.err (!%p1205_p5)
}
  0x30   :  { %37 = dma.hbm_to_vmem [thread:$0]  %s1546_s0, 128, %s35_s20, [#allocation3]  }
  0x31   :  { %s1217_s25 = scalar_lea.vmem %s54_s4, 128  ;;  %p1222_p7 = scmp.lt.s32.totalorder %s54_s4, %s54_s4 }
  0x32   :  { %p1218_p6 = scmp.ne.s32.totalorder %s54_s4, %s1217_s25  ;;  %p1223_p8 = scmp.lt.s32.totalorder %s1217_s25, %s1217_s25 }
  0x34   :  { %p1224_p9 = por %p1223_p8, %p1222_p7 }
  0x36   :  { %p1225_p10 = pnand %p1224_p9, %p1218_p6 }
  0x38   :  { %1228 = shalt.err (!%p1225_p10)
}
  0x39   :  { %59 = dma.hbm_to_vmem [thread:$0]  %s1548_s2, 128, %s54_s4, [#allocation6], %s1346_s28, %s1346_s28, %s1347_s29  }
  0x3a   :  { %s1350_s27 = smov [#allocation10]  }
  0x3b   :  { %s81_s30 = sshll.u32 %s1350_s27, 4  ;;  %s82_s30 = int_to_ptr.vmem [resolvable:$true] %s81_s30 }
  0x3c   :  { %s1237_s16 = scalar_lea.vmem %s82_s30, 2048  ;;  %p1242_p12 = scmp.lt.s32.totalorder %s82_s30, %s82_s30 }
  0x3d   :  { %p1238_p11 = scmp.ne.s32.totalorder %s82_s30, %s1237_s16  ;;  %p1243_p13 = scmp.lt.s32.totalorder %s1237_s16, %s1237_s16 }
  0x3f   :  { %p1244_p0 = por %p1243_p13, %p1242_p12 }
  0x41   :  { %p1245_p1 = pnand %p1244_p0, %p1238_p11 }
  0x43   :  { %1248 = shalt.err (!%p1245_p1)
}
  0x44   :  { %s1351_s0 = smov 128   ;;  %s1352_s1 = smov 8  }
  0x45   :  { %87 = dma.hbm_to_vmem [thread:$0]  %s1552_s6, 2048, %s82_s30, [#allocation9], %s1351_s0, %s1351_s0, %s1352_s1  }
  0x46   :  { %s1353_s19 = smov [#allocation13]   ;;  %s1354_s21 = smov [#allocation14]  }
  0x47   :  { %s109_s20 = sshll.u32 %s1353_s19, 4  ;;  %s123_s2 = sshll.u32 %s1354_s21, 4  ;;  %s110_s20 = int_to_ptr.vmem [resolvable:$true] %s109_s20  ;;  %s124_s2 = int_to_ptr.vmem [resolvable:$true] %s123_s2 }
  0x48   :  { %s1257_s4 = scalar_lea.vmem %s110_s20, 1024  ;;  %p1262_p3 = scmp.lt.s32.totalorder %s110_s20, %s110_s20 }
  0x49   :  { %p1258_p2 = scmp.ne.s32.totalorder %s110_s20, %s1257_s4  ;;  %p1263_p4 = scmp.lt.s32.totalorder %s1257_s4, %s1257_s4 }
  0x4b   :  { %p1264_p5 = por %p1263_p4, %p1262_p3 }
  0x4d   :  { %p1265_p6 = pnand %p1264_p5, %p1258_p2 }
  0x4f   :  { %1268 = shalt.err (!%p1265_p6)
}
  0x50   :  { %115 = dma.hbm_to_vmem [thread:$0]  %s1556_s10, 1024, %s110_s20, [#allocation12], %s1346_s28, %s1346_s28, %s1347_s29  }
  0x51   :  { %s1277_s6 = scalar_lea.vmem %s124_s2, 1024  ;;  %p1282_p8 = scmp.lt.s32.totalorder %s124_s2, %s124_s2 }
  0x52   :  { %p1278_p7 = scmp.ne.s32.totalorder %s124_s2, %s1277_s6  ;;  %p1283_p9 = scmp.lt.s32.totalorder %s1277_s6, %s1277_s6 }
  0x54   :  { %p1284_p10 = por %p1283_p9, %p1282_p8 }
  0x56   :  { %p1285_p11 = pnand %p1284_p10, %p1278_p7 }
  0x58   :  { %1288 = shalt.err (!%p1285_p11)
}
  0x59   :  { %129 = dma.hbm_to_vmem [thread:$0]  %s1558_s12, 1024, %s124_s2, [#allocation15], %s1346_s28, %s1346_s28, %s1347_s29  }
  0x5a   :  { %1329 = dma.done.wait [#allocation3], 128  }
  0x5b   :  { %1330 = vsyncadd [#allocation3], 4294967168 }
  0x5c   :  { %1331 = dma.done.wait [#allocation6], 256  }
  0x5d   :  { %1332 = vsyncadd [#allocation6], 4294967040 }
  0x5e   :  { %1333 = dma.done.wait [#allocation9], 3072  }
  0x5f   :  { %1334 = vsyncadd [#allocation9], 4294964224 }
  0x60   :  { %1335 = dma.done.wait [#allocation12], 2048  }
  0x61   :  { %1336 = vsyncadd [#allocation12], 4294965248 }
  0x62   :  { %1337 = dma.done.wait [#allocation15], 1024  }
  0x63   :  { %1338 = vsyncadd [#allocation15], 4294966272  ;;  %v1355_v0 = vmov 0.0   ;;  %vm1356_vm0 = vmmov 0   ;;  %v1066_v1 = vld [vmem:[#allocation7] sm:$0xff]   ;;  %v157_v2 = vld [vmem:[#allocation2] sm:$0xff]  ;;  %v351_v59 = vlaneseq }
  0x64   :  { %963 = vmatprep.subr.bf16.mxu0 %v1355_v0  ;;  %965 = vmatprep.mubr.msk.bf16.mxu0 %vm1356_vm0, %v1355_v0  ;;  %v158_v3 = vpack.c.bf16 %v157_v2, %v157_v2  ;;  %vm174_vm1 = vcmask 130048   ;;  %v1067_v4 = vld [vmem:[#allocation8 + $0x38] sm:$0xff]   ;;  %v1068_v5 = vld [vmem:[#allocation8 + $0x30] sm:$0xff]   ;;  %v1069_v6 = vld [vmem:[#allocation8 + $0x28] sm:$0xff]   ;;  %v1357_v36 = vmov 0  }
  0x65   :  { %969 = vmatprep.subr.bf16.mxu1 %v1355_v0  ;;  %985 = vmatprep.mubr.msk.bf16.mxu1 %vm1356_vm0, %v1355_v0  ;;  %v1070_v7 = vld [vmem:[#allocation8 + $0x20] sm:$0xff]   ;;  %v1071_v8 = vld [vmem:[#allocation8 + $0x18] sm:$0xff]   ;;  %v1072_v9 = vld [vmem:[#allocation8 + $0x10] sm:$0xff]   ;;  %v352_v60 = vshrl.u32 %v351_v59, 7 }
  0x66   :  { %964 = vmatpush3.bf16.msra.mxu0 %v1066_v1  ;;  %970 = vmatpush3.bf16.msra.mxu1 %v1067_v4  ;;  %v1073_v10 = vld [vmem:[#allocation8 + $0x8] sm:$0xff]   ;;  %v1074_v11 = vld [vmem:[#allocation8] sm:$0xff]   ;;  %v1075_v12 = vld [vmem:[#allocation10 + $0x70] ss:$8 sps:$4 sm:$0xff]  }
  0x67   :  { %971 = vmatprep.subr.bf16.mxu1 %v1355_v0  ;;  %v1077_v13 = vld [vmem:[#allocation10 + $0x74] ss:$8 sps:$4 sm:$0xff]   ;;  %v1080_v14 = vld [vmem:[#allocation10 + $0x64] ss:$8 sps:$4 sm:$0xff]   ;;  %v1078_v15 = vld [vmem:[#allocation10 + $0x60] ss:$8 sps:$4 sm:$0xff]  }
  0x68   :  { %441 = vmatprep.subr.bf16.mxu0 %v1077_v13  ;;  %v1083_v16 = vld [vmem:[#allocation10 + $0x54] ss:$8 sps:$4 sm:$0xff]   ;;  %v1081_v17 = vld [vmem:[#allocation10 + $0x50] ss:$8 sps:$4 sm:$0xff]   ;;  %v1086_v18 = vld [vmem:[#allocation10 + $0x44] ss:$8 sps:$4 sm:$0xff]  }
  0x69   :  { %966 = vmatmul.mubr.msk.bf16.vlgmr.msra.gmra.mxu0 %vm174_vm1, %v158_v3  ;;  %v1084_v19 = vld [vmem:[#allocation10 + $0x40] ss:$8 sps:$4 sm:$0xff]   ;;  %v1089_v20 = vld [vmem:[#allocation10 + $0x34] ss:$8 sps:$4 sm:$0xff]   ;;  %v1087_v21 = vld [vmem:[#allocation10 + $0x30] ss:$8 sps:$4 sm:$0xff]  }
  0x6a   :  { %972 = vmatpush3.bf16.msra.mxu1 %v1068_v5  ;;  %442 = vmatpush1.bf16.msra.mxu0 %v1075_v12  ;;  %v1092_v22 = vld [vmem:[#allocation10 + $0x24] ss:$8 sps:$4 sm:$0xff]   ;;  %v1090_v23 = vld [vmem:[#allocation10 + $0x20] ss:$8 sps:$4 sm:$0xff]   ;;  %v1095_v24 = vld [vmem:[#allocation10 + $0x14] ss:$8 sps:$4 sm:$0xff]  }
  0x6b   :  { %973 = vmatprep.subr.bf16.mxu1 %v1355_v0  ;;  %443 = vmatprep.subr.bf16.mxu0 %v1080_v14  ;;  %v1093_v25 = vld [vmem:[#allocation10 + $0x10] ss:$8 sps:$4 sm:$0xff]   ;;  %v869_v26 = vld [vmem:[%s1549_s3] ss:$0 sm:$0xff]  ;;  %v1098_v34 = vld [vmem:[#allocation10 + $0x4] ss:$8 sps:$4 sm:$0xff]  }
  0x6c   :  { %v1096_v35 = vld [vmem:[#allocation10] ss:$8 sps:$4 sm:$0xff]   ;;  %473 = vmatprep.mubr.bf16.mxu0 %v1357_v36  ;;  %v1099_v37 = vld [vmem:[#allocation11 + $0x38] sm:$0xff]   ;;  %v1100_v46 = vld [vmem:[#allocation11 + $0x30] sm:$0xff]   ;;  %v353_v61 = vsub.s32 0, %v352_v60  ;;  %v357_v63 = vsub.s32 1, %v352_v60 }
  0x6d   :  { %v872_v38 = vld [vmem:[%s1551_s5] ss:$0 sm:$0xff]  ;;  %v1102_v48 = vld [vmem:[#allocation11 + $0x20] sm:$0xff]   ;;  %v1103_v49 = vld [vmem:[#allocation11 + $0x18] sm:$0xff]  }
  0x6e   :  { %974 = vmatpush3.bf16.msra.mxu1 %v1069_v6  ;;  %444 = vmatpush1.bf16.msra.mxu0 %v1078_v15  ;;  %v1101_v47 = vld [vmem:[#allocation11 + $0x28] sm:$0xff]   ;;  %v1104_v50 = vld [vmem:[#allocation11 + $0x10] sm:$0xff]   ;;  %v1106_v52 = vld [vmem:[#allocation11] sm:$0xff]  }
  0x6f   :  { %975 = vmatprep.subr.bf16.mxu1 %v1355_v0  ;;  %445 = vmatprep.subr.bf16.mxu0 %v1083_v16  ;;  %v1105_v51 = vld [vmem:[#allocation11 + $0x8] sm:$0xff]   ;;  %v1107_v53 = vld [vmem:[#allocation13 + $0x38] sm:$0xff]   ;;  %v1108_v54 = vld [vmem:[#allocation13 + $0x30] sm:$0xff]  }
  0x70   :  { %v1109_v55 = vld [vmem:[#allocation13 + $0x28] sm:$0xff]   ;;  %v1110_v56 = vld [vmem:[#allocation13 + $0x20] sm:$0xff]   ;;  %v1111_v57 = vld [vmem:[#allocation13 + $0x18] sm:$0xff]  }
  0x71   :  { %v1112_v58 = vld [vmem:[#allocation13 + $0x10] sm:$0xff]   ;;  %v349_v62 = vld [vmem:[%s1553_s7] sm:$0x3] }
  0x72   :  { %976 = vmatpush3.bf16.msra.mxu1 %v1070_v7  ;;  %446 = vmatpush1.bf16.msra.mxu0 %v1081_v17  ;;  %v354_v1 = vrot.slane %v349_v62, %v353_v61  ;;  %v358_v2 = vrot.slane %v349_v62, %v357_v63  ;;  %v1113_v16 = vld [vmem:[#allocation13 + $0x8] sm:$0xff]   ;;  %v1114_v17 = vld [vmem:[#allocation13] sm:$0xff]  }
  0x73   :  { %977 = vmatprep.subr.bf16.mxu1 %v1355_v0  ;;  %447 = vmatprep.subr.bf16.mxu0 %v1086_v18  ;;  %v1115_v18 = vld [vmem:[#allocation14 + $0x38] sm:$0xff]  }
  0x76   :  { %978 = vmatpush3.bf16.msra.mxu1 %v1071_v8  ;;  %448 = vmatpush1.bf16.msra.mxu0 %v1084_v19  ;;  %v1116_v19 = vld [vmem:[#allocation14 + $0x30] sm:$0xff]  }
  0x77   :  { %979 = vmatprep.subr.bf16.mxu1 %v1355_v0  ;;  %449 = vmatprep.subr.bf16.mxu0 %v1089_v20  ;;  %v1117_v20 = vld [vmem:[#allocation14 + $0x28] sm:$0xff]  }
  0x7a   :  { %980 = vmatpush3.bf16.msra.mxu1 %v1072_v9  ;;  %450 = vmatpush1.bf16.msra.mxu0 %v1087_v21  ;;  %v1118_v21 = vld [vmem:[#allocation14 + $0x20] sm:$0xff]  }
  0x7b   :  { %981 = vmatprep.subr.bf16.mxu1 %v1355_v0  ;;  %451 = vmatprep.subr.bf16.mxu0 %v1092_v22  ;;  %v1119_v22 = vld [vmem:[#allocation14 + $0x18] sm:$0xff]  }
  0x7e   :  { %982 = vmatpush3.bf16.msra.mxu1 %v1073_v10  ;;  %452 = vmatpush1.bf16.msra.mxu0 %v1090_v23  ;;  %v1120_v23 = vld [vmem:[#allocation14 + $0x10] sm:$0xff]  }
  0x7f   :  { %983 = vmatprep.subr.bf16.mxu1 %v1355_v0  ;;  %453 = vmatprep.subr.bf16.mxu0 %v1095_v24  ;;  %v897_v24 = vld [vmem:[%s1555_s9] ss:$0 sm:$0xff]  ;;  %s1358_s9 = smov [#allocation17]  }
  0x80   :  { %s852_s30 = sshll.u32 %s1358_s9, 4  ;;  %s853_s30 = int_to_ptr.vmem [resolvable:$true] %s852_s30 }
  0x81   :  { %s1289_s16 = scalar_lea.vmem %s853_s30, 256  ;;  %p1294_p13 = scmp.lt.s32.totalorder %s853_s30, %s853_s30 }
  0x82   :  { %984 = vmatpush3.bf16.msra.mxu1 %v1074_v11  ;;  %454 = vmatpush1.bf16.msra.mxu0 %v1093_v25  ;;  %v484_v11 = vld [vmem:[#allocation5] sm:$0xff]  ;;  %p1290_p12 = scmp.ne.s32.totalorder %s853_s30, %s1289_s16  ;;  %p1295_p0 = scmp.lt.s32.totalorder %s1289_s16, %s1289_s16 }
  0x83   :  { %989 = vmatprep.subr.bf16.mxu1 %v1355_v0  ;;  %455 = vmatprep.subr.bf16.mxu0 %v1098_v34  ;;  %v906_v34 = vld [vmem:[%s1557_s11] ss:$0 sm:$0xff] }
  0x84   :  { %p1296_p1 = por %p1295_p0, %p1294_p13 }
  0x86   :  { %456 = vmatpush1.bf16.msra.mxu0 %v1096_v35  ;;  %p1297_p2 = pnand %p1296_p1, %p1290_p12 }
  0x87   :  { %1009 = vmatprep.subr.bf16.mxu0 %v1355_v0 }
 0x129   :  { %v212_v27 = vpop.f32.mrf.mxu0 }
 0x12a   :  { %v213_v28 = vadd.f32 %v869_v26, %v212_v27 }
 0x12b   :  { %v967_v29 = vpop.f32.mrf.mxu0 }
 0x12c   :  { %v218_v30 = vmax.f32 %v213_v28, 0.0 }
 0x12d   :  { %v215_v31 = vpop.f32.mrf.mxu0 }
 0x12e   :  { %v219_v32 = vpack.c.bf16 %v218_v30, %v218_v30 }
 0x12f   :  { %v968_v33 = vpop.f32.mrf.mxu0 }
 0x130   :  { %986 = vmatmul.mubr.bf16.vlgmr.msra.gmra.mxu1 %v219_v32  ;;  %v1121_v32 = vld [vmem:[#allocation14 + $0x8] sm:$0xff]   ;;  %v1122_v33 = vld [vmem:[#allocation14] sm:$0xff]  }
 0x131   :  { %1005 = vmatprep.mubr.msk.bf16.mxu1 %vm1356_vm0, %v1355_v0  ;;  %990 = vmatpush3.bf16.msra.mxu1 %v1099_v37 }
 0x132   :  { %991 = vmatprep.subr.bf16.mxu1 %v1355_v0 }
 0x135   :  { %992 = vmatpush3.bf16.msra.mxu1 %v1100_v46 }
 0x136   :  { %993 = vmatprep.subr.bf16.mxu1 %v1355_v0 }
 0x139   :  { %994 = vmatpush3.bf16.msra.mxu1 %v1101_v47 }
 0x13a   :  { %995 = vmatprep.subr.bf16.mxu1 %v1355_v0 }
 0x13d   :  { %996 = vmatpush3.bf16.msra.mxu1 %v1102_v48 }
 0x13e   :  { %997 = vmatprep.subr.bf16.mxu1 %v1355_v0 }
 0x141   :  { %998 = vmatpush3.bf16.msra.mxu1 %v1103_v49 }
 0x142   :  { %999 = vmatprep.subr.bf16.mxu1 %v1355_v0 }
 0x145   :  { %1000 = vmatpush3.bf16.msra.mxu1 %v1104_v50 }
 0x146   :  { %1001 = vmatprep.subr.bf16.mxu1 %v1355_v0 }
 0x149   :  { %1002 = vmatpush3.bf16.msra.mxu1 %v1105_v51 }
 0x14a   :  { %1003 = vmatprep.subr.bf16.mxu1 %v1355_v0 }
 0x14d   :  { %1004 = vmatpush3.bf16.msra.mxu1 %v1106_v52 }
 0x14e   :  { %1029 = vmatprep.subr.bf16.mxu1 %v1355_v0 }
 0x1f0   :  { %v325_v39 = vpop.f32.mrf.mxu1 }
 0x1f1   :  { %v326_v40 = vadd.f32 %v872_v38, %v325_v39 }
 0x1f2   :  { %v987_v41 = vpop.f32.mrf.mxu1 }
 0x1f3   :  { %v331_v42 = vmax.f32 %v326_v40, 0.0 }
 0x1f4   :  { %v328_v43 = vpop.f32.mrf.mxu1 }
 0x1f5   :  { %v332_v44 = vpack.c.bf16 %v331_v42, %v331_v42 }
 0x1f6   :  { %v988_v45 = vpop.f32.mrf.mxu1 }
 0x1f7   :  { %474 = vmatmul.mubr.bf16.vlgmr.msra.gmra.mxu0 %v332_v44 }
 0x1f8   :  { %1025 = vmatprep.mubr.msk.bf16.mxu0 %vm1356_vm0, %v1355_v0  ;;  %1010 = vmatpush3.bf16.msra.mxu0 %v1107_v53 }
 0x1f9   :  { %1011 = vmatprep.subr.bf16.mxu0 %v1355_v0 }
 0x1fc   :  { %1012 = vmatpush3.bf16.msra.mxu0 %v1108_v54 }
 0x1fd   :  { %1013 = vmatprep.subr.bf16.mxu0 %v1355_v0 }
 0x200   :  { %1014 = vmatpush3.bf16.msra.mxu0 %v1109_v55 }
 0x201   :  { %1015 = vmatprep.subr.bf16.mxu0 %v1355_v0 }
 0x204   :  { %1016 = vmatpush3.bf16.msra.mxu0 %v1110_v56 }
 0x205   :  { %1017 = vmatprep.subr.bf16.mxu0 %v1355_v0 }
 0x208   :  { %1018 = vmatpush3.bf16.msra.mxu0 %v1111_v57 }
 0x209   :  { %1019 = vmatprep.subr.bf16.mxu0 %v1355_v0 }
 0x20c   :  { %1020 = vmatpush3.bf16.msra.mxu0 %v1112_v58 }
 0x20d   :  { %1021 = vmatprep.subr.bf16.mxu0 %v1355_v0 }
 0x210   :  { %1022 = vmatpush3.bf16.msra.mxu0 %v1113_v16 }
 0x211   :  { %1023 = vmatprep.subr.bf16.mxu0 %v1355_v0 }
 0x214   :  { %1024 = vmatpush3.bf16.msra.mxu0 %v1114_v17 }
 0x2b7   :  { %v475_v3 = vpop.f32.mrf.mxu0 }
 0x2b8   :  { %v476_v4 = vadd.f32 %v475_v3, %v354_v1 }
 0x2b9   :  { %v477_v5 = vpop.f32.mrf.mxu0 }
 0x2ba   :  { %482 = vst [vmem:[#allocation17] sm:$0xff] %v476_v4  ;;  %v478_v6 = vadd.f32 %v477_v5, %v358_v2 }
 0x2bb   :  { %v479_v7 = vpop.f32.mrf.mxu0 }
 0x2bc   :  { %483 = vst [vmem:[#allocation17 + $0x8] sm:$0xff] %v478_v6  ;;  %v485_v8 = vmul.f32 0.5, %v478_v6 }
 0x2bd   :  { %v480_v9 = vpop.f32.mrf.mxu0 }
 0x2be   :  { %v486_v10 = vmul.f32 1.442695, %v485_v8 }
 0x2c0   :  { %1123 = vpow2.f32 %v486_v10 }
 0x2cd   :  { %v1124_v12 = vpop.eup %1123 }
 0x2ce   :  { %v488_v13 = vmul.f32 %v1124_v12, %v484_v11 }
 0x2d0   :  { %v489_v14 = vadd.f32 %v488_v13, %v476_v4 }
 0x2d2   :  { %v490_v15 = vpack.c.bf16 %v489_v14, %v489_v14 }
 0x2d4   :  { %1006 = vmatmul.mubr.bf16.vlgmr.msra.gmra.mxu1 %v490_v15 }
 0x2d5   :  { %1045 = vmatprep.mubr.msk.bf16.mxu1 %vm1356_vm0, %v1355_v0  ;;  %1030 = vmatpush3.bf16.msra.mxu1 %v1115_v18 }
 0x2d6   :  { %1031 = vmatprep.subr.bf16.mxu1 %v1355_v0 }
 0x2d9   :  { %1032 = vmatpush3.bf16.msra.mxu1 %v1116_v19 }
 0x2da   :  { %1033 = vmatprep.subr.bf16.mxu1 %v1355_v0 }
 0x2dd   :  { %1034 = vmatpush3.bf16.msra.mxu1 %v1117_v20 }
 0x2de   :  { %1035 = vmatprep.subr.bf16.mxu1 %v1355_v0 }
 0x2e1   :  { %1036 = vmatpush3.bf16.msra.mxu1 %v1118_v21 }
 0x2e2   :  { %1037 = vmatprep.subr.bf16.mxu1 %v1355_v0 }
 0x2e5   :  { %1038 = vmatpush3.bf16.msra.mxu1 %v1119_v22 }
 0x2e6   :  { %1039 = vmatprep.subr.bf16.mxu1 %v1355_v0 }
 0x2e9   :  { %1040 = vmatpush3.bf16.msra.mxu1 %v1120_v23 }
 0x2ea   :  { %1041 = vmatprep.subr.bf16.mxu1 %v1355_v0 }
 0x2ed   :  { %1042 = vmatpush3.bf16.msra.mxu1 %v1121_v32 }
 0x2ee   :  { %1043 = vmatprep.subr.bf16.mxu1 %v1355_v0 }
 0x2f1   :  { %1044 = vmatpush3.bf16.msra.mxu1 %v1122_v33 }
 0x394   :  { %v596_v25 = vpop.f32.mrf.mxu1 }
 0x395   :  { %v597_v26 = vadd.f32 %v897_v24, %v596_v25 }
 0x396   :  { %v1007_v27 = vpop.f32.mrf.mxu1 }
 0x397   :  { %v602_v28 = vmax.f32 %v597_v26, 0.0 }
 0x398   :  { %v599_v29 = vpop.f32.mrf.mxu1 }
 0x399   :  { %v603_v30 = vpack.c.bf16 %v602_v28, %v602_v28 }
 0x39a   :  { %v1008_v31 = vpop.f32.mrf.mxu1 }
 0x39b   :  { %1026 = vmatmul.mubr.bf16.vlgmr.msra.gmra.mxu0 %v603_v30 }
 0x45b   :  { %v709_v35 = vpop.f32.mrf.mxu0 }
 0x45c   :  { %v710_v36 = vadd.f32 %v906_v34, %v709_v35 }
 0x45d   :  { %v1027_v37 = vpop.f32.mrf.mxu0 }
 0x45e   :  { %v715_v38 = vmax.f32 %v710_v36, 0.0 }
 0x45f   :  { %v712_v39 = vpop.f32.mrf.mxu0 }
 0x460   :  { %v716_v40 = vpack.c.bf16 %v715_v38, %v715_v38 }
 0x461   :  { %v1028_v41 = vpop.f32.mrf.mxu0 }
 0x462   :  { %1046 = vmatmul.mubr.bf16.vlgmr.msra.gmra.mxu1 %v716_v40 }
 0x463   :  { %1300 = shalt.err (!%p1297_p2)
}
 0x464   :  { %855 = dma.vmem_to_hbm [thread:$0]  %s853_s30, 256, %s1561_s15, [#allocation18]   ;;  %v915_v0 = vld [vmem:[%s1559_s13] ss:$0 sm:$0xff] }
 0x465   :  { %s1359_s18 = smov [#allocation16]  }
 0x466   :  { %s842_s19 = sshll.u32 %s1359_s18, 4  ;;  %s843_s19 = int_to_ptr.vmem [resolvable:$true] %s842_s19 }
 0x467   :  { %s1309_s15 = scalar_lea.vmem %s843_s19, 64  ;;  %p1314_p4 = scmp.lt.s32.totalorder %s843_s19, %s843_s19 }
 0x468   :  { %p1310_p3 = scmp.ne.s32.totalorder %s843_s19, %s1309_s15  ;;  %p1315_p5 = scmp.lt.s32.totalorder %s1309_s15, %s1309_s15 }
 0x46a   :  { %p1316_p6 = por %p1315_p5, %p1314_p4 }
 0x46c   :  { %p1317_p7 = pnand %p1316_p6, %p1310_p3 }
 0x522   :  { %v822_v42 = vpop.f32.mrf.mxu1 }
 0x523   :  { %v823_v43 = vadd.f32 %v915_v0, %v822_v42 }
 0x524   :  { %v1047_v44 = vpop.f32.mrf.mxu1 }
 0x525   :  { %v924_v45 = vmul.f32 -1.442695, %v823_v43 }
 0x526   :  { %v825_v46 = vpop.f32.mrf.mxu1 }
 0x527   :  { %1125 = vpow2.f32 %v924_v45 }
 0x528   :  { %v1048_v47 = vpop.f32.mrf.mxu1 }
 0x534   :  { %v1126_v48 = vpop.eup %1125 }
 0x535   :  { %v831_v49 = vadd.f32 1.0, %v1126_v48 }
 0x537   :  { %1127 = vrcp.f32 %v831_v49 }
 0x544   :  { %v1128_v50 = vpop.eup %1127 }
 0x545   :  { %v834_v51 = vpack.c.bf16 %v1128_v50, %v1128_v50 }
 0x547   :  { %835 = vst [vmem:[#allocation16] sm:$0xf] %v834_v51 }
 0x548   :  { %1320 = shalt.err (!%p1317_p7)
}
 0x549   :  { %845 = dma.vmem_to_hbm [thread:$0]  %s843_s19, 64, %s1560_s14, [#allocation4]  }
 0x54a   :  { %1339 = dma.done.wait [#allocation4], 64  }
 0x54b   :  { %1340 = vsyncadd [#allocation4], 4294967232 }
 0x54c   :  { %1341 = dma.done.wait [#allocation18], 256  }
 0x54d   :  { %1342 = vsyncadd [#allocation18], 4294967040 }
 0x54e   :  { %862 = vsyncpa [#allocation3], 1 }
 0x54f   :  { %863 = vsyncpa [#allocation6], 1 }
 0x550   :  { %864 = vsyncpa [#allocation9], 1 }
 0x551   :  { %865 = vsyncpa [#allocation12], 1 }
 0x552   :  { %866 = vsyncpa [#allocation15], 1 }
 0x553   :  { %867 = vsyncpa [#allocation4], 1 }
 0x554   :  { %868 = vsyncpa [#allocation18], 1 }

</bundles_post_ra>
